<compile_context>
chip_gen: v7x
topology: tpu7x:2x2x1
jax: 0.10.0
libtpu: 0.0.40
codegen_flags: <defaults>
</compile_context>

<pallas_src>
import functools

import jax
import jax.numpy as jnp
from jax import lax
from jax.experimental import pallas as pl
from jax.experimental.pallas import tpu as pltpu


def _conv3x3_bias_relu_kernel(x_ref, w_ref, b_ref, o_ref, *, W_p, N):
    """Per-batch 3x3 conv (9 accumulated MXU matmuls) + bias + ReLU.

    x_ref : (1, C_in, L)      row-flattened reflection-padded image (L lane-aligned)
    w_ref : (9, C_out, C_in)  per-tap weight matrices, tap index = 3*di + dj
    b_ref : (C_out, 1)        bias column
    o_ref : (1, C_out, N)     N = H * W_p flattened conv outputs (lane-dense)
    """
    x = x_ref[0].astype(jnp.float32)        # single hoisted load + cast
    w = w_ref[...].astype(jnp.float32)      # (9, C_out, C_in), hoisted
    c_out = w.shape[1]

    acc = jnp.zeros((c_out, N), jnp.float32)
    # 9 static taps; each shift is just a lane offset into the flattened image.
    for di in range(3):
        for dj in range(3):
            off = di * W_p + dj
            acc = acc + jnp.dot(
                w[3 * di + dj],              # (C_out, C_in)
                x[:, off:off + N],           # (C_in, N)
                preferred_element_type=jnp.float32,
            )

    acc = acc + b_ref[...].astype(jnp.float32)              # bias (broadcast over lanes)
    o_ref[0] = jnp.maximum(acc, 0.0).astype(o_ref.dtype)    # activation = relu


def upsample_block(x, weight, bias):
    """Pallas equivalent of upsampleBlock.forward(x) with the default relu activation.

    x      : (B, C_in, H, W) float32
    weight : (C_out, C_in, 3, 3) Conv2d weight, C_out % 4 == 0
    bias   : (C_out,)
    returns: (B, C_out // 4, 2H, 2W) float32
    """
    B, C_in, H, W = x.shape
    C_out = weight.shape[0]
    assert weight.shape == (C_out, C_in, 3, 3)
    assert C_out % 4 == 0, "PixelShuffle(2) needs C_out divisible by 4"

    H_p, W_p = H + 2, W + 2
    N = H * W_p                                   # flattened conv outputs (incl. 2 junk cols/row)
    L = ((H_p * W_p + 2 + 127) // 128) * 128      # lane-aligned flat input length
    # Max flat index read = (N-1) + 2*W_p + 2 = H_p*W_p + 1 < L  -> zero tail only feeds
    # the junk columns that the wrapper slices away.

    # ReflectionPad2d(1), then flatten rows so every conv tap is a pure lane offset.
    # TODO(synk): for large images, fold the pad into the kernel (halo rows) and add a
    # row-strip grid axis instead of one whole plane per step.
    xp = jnp.pad(x, ((0, 0), (0, 0), (1, 1), (1, 1)), mode="reflect")
    x_flat = xp.reshape(B, C_in, H_p * W_p)
    x_flat = jnp.pad(x_flat, ((0, 0), (0, 0), (0, L - H_p * W_p)))

    # (C_out, C_in, 3, 3) -> (9, C_out, C_in): one matmul LHS per tap.
    w_taps = jnp.transpose(weight, (2, 3, 0, 1)).reshape(9, C_out, C_in)
    b_col = bias.reshape(C_out, 1)

    conv_flat = pl.pallas_call(
        functools.partial(_conv3x3_bias_relu_kernel, W_p=W_p, N=N),
        out_shape=jax.ShapeDtypeStruct((B, C_out, N), x.dtype),
        grid=(B,),
        in_specs=[
            pl.BlockSpec((1, C_in, L), lambda b: (b, 0, 0)),
            pl.BlockSpec((9, C_out, C_in), lambda b: (0, 0, 0)),
            pl.BlockSpec((C_out, 1), lambda b: (0, 0)),
        ],
        out_specs=pl.BlockSpec((1, C_out, N), lambda b: (b, 0, 0)),
        compiler_params=pltpu.CompilerParams(
            dimension_semantics=("parallel",),   # >= 2 even steps -> both v7x TCs busy
        ),
    )(x_flat, w_taps, b_col)

    # Drop the 2 junk columns per row, then PixelShuffle(2) -- pure layout plumbing.
    conv = conv_flat.reshape(B, C_out, H, W_p)[:, :, :, :W]
    y = conv.reshape(B, C_out // 4, 2, 2, H, W)
    y = jnp.transpose(y, (0, 1, 4, 2, 5, 3)).reshape(B, C_out // 4, 2 * H, 2 * W)
    return y                                     # ReLU already applied in-kernel


def _reference_upsample_block(x, weight, bias):
    """Plain-JAX reference mirroring the PyTorch forward pass."""
    xp = jnp.pad(x, ((0, 0), (0, 0), (1, 1), (1, 1)), mode="reflect")
    conv = lax.conv_general_dilated(
        xp, weight, window_strides=(1, 1), padding="VALID",
        dimension_numbers=("NCHW", "OIHW", "NCHW"),
        precision=lax.Precision.HIGHEST,
    ) + bias[None, :, None, None]
    B, C_out, H, W = conv.shape
    r = 2
    y = conv.reshape(B, C_out // (r * r), r, r, H, W)
    y = jnp.transpose(y, (0, 1, 4, 2, 5, 3)).reshape(B, C_out // (r * r), H * r, W * r)
    return jnp.maximum(y, 0.0)


if __name__ == "__main__":
    B, C_in, H, W = 2, 4, 16, 16
    C_out = 16          # PixelShuffle(2) -> 4 output channels at 32x32

    key = jax.random.PRNGKey(0)
    kx, kw, kb = jax.random.split(key, 3)

    x = jax.random.normal(kx, (B, C_in, H, W), dtype=jnp.float32)
    bound = 1.0 / (C_in * 9) ** 0.5          # PyTorch-style Conv2d init range
    weight = jax.random.uniform(kw, (C_out, C_in, 3, 3), jnp.float32, -bound, bound)
    bias = jax.random.uniform(kb, (C_out,), jnp.float32, -bound, bound)

    out = jax.block_until_ready(upsample_block(x, weight, bias))
    ref = _reference_upsample_block(x, weight, bias)

    assert out.shape == (B, C_out // 4, 2 * H, 2 * W)
    assert float(jnp.max(jnp.abs(out - ref))) < 1e-3

    print("KERNEL_OK")
</pallas_src>

<mosaic_0001>
module attributes {stable_mosaic.version = 11 : i64} {
  func.func @_conv3x3_bias_relu_kernel(%arg0: i32, %arg1: memref<1x4x384xf32, #tpu.memory_space<vmem>>, %arg2: memref<9x16x4xf32, #tpu.memory_space<vmem>>, %arg3: memref<16x1xf32, #tpu.memory_space<vmem>>, %arg4: memref<1x16x288xf32, #tpu.memory_space<vmem>>) attributes {dimension_semantics = [#tpu.dimension_semantics<parallel>], iteration_bounds = array<i64: 2>, scalar_prefetch = 0 : i64, scratch_operands = 0 : i64, tpu.core_type = #tpu.core_type<tc>, window_params = [{transform_indices = @transform_0, window_bounds = array<i64: 1, 4, 384>}, {pipeline_mode = #tpu.pipeline_mode<synchronous>, transform_indices = @transform_1, window_bounds = array<i64: 9, 16, 4>}, {pipeline_mode = #tpu.pipeline_mode<synchronous>, transform_indices = @transform_2, window_bounds = array<i64: 16, 1>}, {transform_indices = @transform_3, window_bounds = array<i64: 1, 16, 288>}]} {
    %c0 = arith.constant 0 : index
    %c0_0 = arith.constant 0 : index
    %c0_1 = arith.constant 0 : index
    %0 = vector.load %arg1[%c0, %c0_0, %c0_1] : memref<1x4x384xf32, #tpu.memory_space<vmem>>, vector<1x4x384xf32>
    %1 = vector.shape_cast %0 : vector<1x4x384xf32> to vector<4x384xf32>
    %c0_2 = arith.constant 0 : index
    %c0_3 = arith.constant 0 : index
    %c0_4 = arith.constant 0 : index
    %2 = vector.load %arg2[%c0_2, %c0_3, %c0_4] : memref<9x16x4xf32, #tpu.memory_space<vmem>>, vector<9x16x4xf32>
    %cst = arith.constant 0.000000e+00 : f32
    %3 = vector.broadcast %cst : f32 to vector<16x288xf32>
    %4 = vector.extract_strided_slice %2 {offsets = [0, 0, 0], sizes = [1, 16, 4], strides = [1, 1, 1]} : vector<9x16x4xf32> to vector<1x16x4xf32>
    %5 = vector.shape_cast %4 : vector<1x16x4xf32> to vector<16x4xf32>
    %6 = vector.extract_strided_slice %1 {offsets = [0, 0], sizes = [4, 288], strides = [1, 1]} : vector<4x384xf32> to vector<4x288xf32>
    %cst_5 = arith.constant dense<0.000000e+00> : vector<16x288xf32>
    %7 = tpu.matmul %5, %6, %cst_5 {dimension_numbers = #tpu.dot_dimension_numbers<[1], [0], [0], [1], [0, 0, 1, 1], [], []>} : vector<16x4xf32>, vector<4x288xf32>, vector<16x288xf32> -> vector<16x288xf32>
    %8 = arith.addf %3, %7 : vector<16x288xf32>
    %9 = vector.extract_strided_slice %2 {offsets = [1, 0, 0], sizes = [1, 16, 4], strides = [1, 1, 1]} : vector<9x16x4xf32> to vector<1x16x4xf32>
    %10 = vector.shape_cast %9 : vector<1x16x4xf32> to vector<16x4xf32>
    %11 = vector.extract_strided_slice %1 {offsets = [0, 1], sizes = [4, 288], strides = [1, 1]} : vector<4x384xf32> to vector<4x288xf32>
    %cst_6 = arith.constant dense<0.000000e+00> : vector<16x288xf32>
    %12 = tpu.matmul %10, %11, %cst_6 {dimension_numbers = #tpu.dot_dimension_numbers<[1], [0], [0], [1], [0, 0, 1, 1], [], []>} : vector<16x4xf32>, vector<4x288xf32>, vector<16x288xf32> -> vector<16x288xf32>
    %13 = arith.addf %8, %12 : vector<16x288xf32>
    %14 = vector.extract_strided_slice %2 {offsets = [2, 0, 0], sizes = [1, 16, 4], strides = [1, 1, 1]} : vector<9x16x4xf32> to vector<1x16x4xf32>
    %15 = vector.shape_cast %14 : vector<1x16x4xf32> to vector<16x4xf32>
    %16 = vector.extract_strided_slice %1 {offsets = [0, 2], sizes = [4, 288], strides = [1, 1]} : vector<4x384xf32> to vector<4x288xf32>
    %cst_7 = arith.constant dense<0.000000e+00> : vector<16x288xf32>
    %17 = tpu.matmul %15, %16, %cst_7 {dimension_numbers = #tpu.dot_dimension_numbers<[1], [0], [0], [1], [0, 0, 1, 1], [], []>} : vector<16x4xf32>, vector<4x288xf32>, vector<16x288xf32> -> vector<16x288xf32>
    %18 = arith.addf %13, %17 : vector<16x288xf32>
    %19 = vector.extract_strided_slice %2 {offsets = [3, 0, 0], sizes = [1, 16, 4], strides = [1, 1, 1]} : vector<9x16x4xf32> to vector<1x16x4xf32>
    %20 = vector.shape_cast %19 : vector<1x16x4xf32> to vector<16x4xf32>
    %21 = vector.extract_strided_slice %1 {offsets = [0, 18], sizes = [4, 288], strides = [1, 1]} : vector<4x384xf32> to vector<4x288xf32>
    %cst_8 = arith.constant dense<0.000000e+00> : vector<16x288xf32>
    %22 = tpu.matmul %20, %21, %cst_8 {dimension_numbers = #tpu.dot_dimension_numbers<[1], [0], [0], [1], [0, 0, 1, 1], [], []>} : vector<16x4xf32>, vector<4x288xf32>, vector<16x288xf32> -> vector<16x288xf32>
    %23 = arith.addf %18, %22 : vector<16x288xf32>
    %24 = vector.extract_strided_slice %2 {offsets = [4, 0, 0], sizes = [1, 16, 4], strides = [1, 1, 1]} : vector<9x16x4xf32> to vector<1x16x4xf32>
    %25 = vector.shape_cast %24 : vector<1x16x4xf32> to vector<16x4xf32>
    %26 = vector.extract_strided_slice %1 {offsets = [0, 19], sizes = [4, 288], strides = [1, 1]} : vector<4x384xf32> to vector<4x288xf32>
    %cst_9 = arith.constant dense<0.000000e+00> : vector<16x288xf32>
    %27 = tpu.matmul %25, %26, %cst_9 {dimension_numbers = #tpu.dot_dimension_numbers<[1], [0], [0], [1], [0, 0, 1, 1], [], []>} : vector<16x4xf32>, vector<4x288xf32>, vector<16x288xf32> -> vector<16x288xf32>
    %28 = arith.addf %23, %27 : vector<16x288xf32>
    %29 = vector.extract_strided_slice %2 {offsets = [5, 0, 0], sizes = [1, 16, 4], strides = [1, 1, 1]} : vector<9x16x4xf32> to vector<1x16x4xf32>
    %30 = vector.shape_cast %29 : vector<1x16x4xf32> to vector<16x4xf32>
    %31 = vector.extract_strided_slice %1 {offsets = [0, 20], sizes = [4, 288], strides = [1, 1]} : vector<4x384xf32> to vector<4x288xf32>
    %cst_10 = arith.constant dense<0.000000e+00> : vector<16x288xf32>
    %32 = tpu.matmul %30, %31, %cst_10 {dimension_numbers = #tpu.dot_dimension_numbers<[1], [0], [0], [1], [0, 0, 1, 1], [], []>} : vector<16x4xf32>, vector<4x288xf32>, vector<16x288xf32> -> vector<16x288xf32>
    %33 = arith.addf %28, %32 : vector<16x288xf32>
    %34 = vector.extract_strided_slice %2 {offsets = [6, 0, 0], sizes = [1, 16, 4], strides = [1, 1, 1]} : vector<9x16x4xf32> to vector<1x16x4xf32>
    %35 = vector.shape_cast %34 : vector<1x16x4xf32> to vector<16x4xf32>
    %36 = vector.extract_strided_slice %1 {offsets = [0, 36], sizes = [4, 288], strides = [1, 1]} : vector<4x384xf32> to vector<4x288xf32>
    %cst_11 = arith.constant dense<0.000000e+00> : vector<16x288xf32>
    %37 = tpu.matmul %35, %36, %cst_11 {dimension_numbers = #tpu.dot_dimension_numbers<[1], [0], [0], [1], [0, 0, 1, 1], [], []>} : vector<16x4xf32>, vector<4x288xf32>, vector<16x288xf32> -> vector<16x288xf32>
    %38 = arith.addf %33, %37 : vector<16x288xf32>
    %39 = vector.extract_strided_slice %2 {offsets = [7, 0, 0], sizes = [1, 16, 4], strides = [1, 1, 1]} : vector<9x16x4xf32> to vector<1x16x4xf32>
    %40 = vector.shape_cast %39 : vector<1x16x4xf32> to vector<16x4xf32>
    %41 = vector.extract_strided_slice %1 {offsets = [0, 37], sizes = [4, 288], strides = [1, 1]} : vector<4x384xf32> to vector<4x288xf32>
    %cst_12 = arith.constant dense<0.000000e+00> : vector<16x288xf32>
    %42 = tpu.matmul %40, %41, %cst_12 {dimension_numbers = #tpu.dot_dimension_numbers<[1], [0], [0], [1], [0, 0, 1, 1], [], []>} : vector<16x4xf32>, vector<4x288xf32>, vector<16x288xf32> -> vector<16x288xf32>
    %43 = arith.addf %38, %42 : vector<16x288xf32>
    %44 = vector.extract_strided_slice %2 {offsets = [8, 0, 0], sizes = [1, 16, 4], strides = [1, 1, 1]} : vector<9x16x4xf32> to vector<1x16x4xf32>
    %45 = vector.shape_cast %44 : vector<1x16x4xf32> to vector<16x4xf32>
    %46 = vector.extract_strided_slice %1 {offsets = [0, 38], sizes = [4, 288], strides = [1, 1]} : vector<4x384xf32> to vector<4x288xf32>
    %cst_13 = arith.constant dense<0.000000e+00> : vector<16x288xf32>
    %47 = tpu.matmul %45, %46, %cst_13 {dimension_numbers = #tpu.dot_dimension_numbers<[1], [0], [0], [1], [0, 0, 1, 1], [], []>} : vector<16x4xf32>, vector<4x288xf32>, vector<16x288xf32> -> vector<16x288xf32>
    %48 = arith.addf %43, %47 : vector<16x288xf32>
    %c0_14 = arith.constant 0 : index
    %c0_15 = arith.constant 0 : index
    %49 = vector.load %arg3[%c0_14, %c0_15] : memref<16x1xf32, #tpu.memory_space<vmem>>, vector<16x1xf32>
    %50 = vector.broadcast %49 : vector<16x1xf32> to vector<16x288xf32>
    %51 = arith.addf %48, %50 : vector<16x288xf32>
    %cst_16 = arith.constant 0.000000e+00 : f32
    %52 = vector.broadcast %cst_16 : f32 to vector<16x288xf32>
    %53 = arith.maximumf %51, %52 : vector<16x288xf32>
    %c0_17 = arith.constant 0 : index
    %c0_18 = arith.constant 0 : index
    %c0_19 = arith.constant 0 : index
    %54 = vector.load %arg4[%c0_17, %c0_18, %c0_19] : memref<1x16x288xf32, #tpu.memory_space<vmem>>, vector<1x16x288xf32>
    %55 = vector.shape_cast %54 : vector<1x16x288xf32> to vector<16x288xf32>
    %56 = vector.shape_cast %53 : vector<16x288xf32> to vector<1x16x288xf32>
    tpu.vector_store %arg4[%c0_17, %c0_18, %c0_19], %56 {strides = array<i32>} : memref<1x16x288xf32, #tpu.memory_space<vmem>>, vector<1x16x288xf32>,
    return
  }
  func.func @transform_0(%arg0: i32) -> (i32, i32, i32) {
    %c0_i32 = arith.constant 0 : i32
    %c0_i32_0 = arith.constant 0 : i32
    %c0_i32_1 = arith.constant 0 : i32
    return %arg0, %c0_i32, %c0_i32_0 : i32, i32, i32
  }
  func.func @transform_1(%arg0: i32) -> (i32, i32, i32) {
    %c0_i32 = arith.constant 0 : i32
    %c0_i32_0 = arith.constant 0 : i32
    %c0_i32_1 = arith.constant 0 : i32
    %c0_i32_2 = arith.constant 0 : i32
    return %c0_i32, %c0_i32_0, %c0_i32_1 : i32, i32, i32
  }
  func.func @transform_2(%arg0: i32) -> (i32, i32) {
    %c0_i32 = arith.constant 0 : i32
    %c0_i32_0 = arith.constant 0 : i32
    %c0_i32_1 = arith.constant 0 : i32
    return %c0_i32, %c0_i32_0 : i32, i32
  }
  func.func @transform_3(%arg0: i32) -> (i32, i32, i32) {
    %c0_i32 = arith.constant 0 : i32
    %c0_i32_0 = arith.constant 0 : i32
    %c0_i32_1 = arith.constant 0 : i32
    return %arg0, %c0_i32, %c0_i32_0 : i32, i32, i32
  }
}

</mosaic_0001>

<bundles_post_ra>
// kernel: tpu_custom_call.1
= control target key start
LH: loop header
LB: loop body
LE: loop exit
PB: predicated region body
PF: predicated region fallthrough
CT: control target
= control target key end

     0   :  { %8 = vsyncpa [#allocation3], 0  ;;  %s2550_s0 = inlined_call_operand.vmem [shape: f32[2,4,384], index: 0, kind: input, shape index: {}]   ;;  %s2551_s1 = inlined_call_operand.vmem [shape: f32[9,16,4], index: 1, kind: input, shape index: {}]   ;;  %s2552_s2 = inlined_call_operand.vmem [shape: f32[16,1], index: 2, kind: input, shape index: {}]   ;;  %s2553_s3 = inlined_call_operand.hbm [shape: f32[2,16,288], index: 3, kind: output, shape index: {}]  }
   0x1   :  { %10 = vsyncpa [#allocation3 + $0x1], 0  ;;  %s2236_s12 = smov 0   ;;  %s2238_s13 = smov 0  }
   0x2   :  { %s2240_s14 = smov 0   ;;  %s2242_s15 = smov 0  }
   0x3 LB: > { %s2257_s16 = sadd.s32 4294967295, %s2201_s15   ;;  %s1891_s17 = sadd.s32 4294967294, %s2201_s15   ;;  %s2201_s15 = sphi %s2242_s15, %s2559_s15   ;;  %s2197_s14 = sphi %s2240_s14, %s2558_s14   ;;  %s2193_s13 = sphi %s2238_s13, %s2557_s13   ;;  %s2189_s12 = sphi %s2236_s12, %s2556_s12  }
   0x4   : > { %s2261_s18 = sadd.s32 1, %s2201_s15   ;;  %s91_s19 = sadd.s32 1, %s2197_s14 }
   0x5   : > { %s88_s20 = ssub.s32 %s2201_s15, %s2261_s18  ;;  %p101_p0 = scmp.ne.s32.totalorder %s2197_s14, %s2193_s13 }
   0x6   : > { %p89_p1 = scmp.eq.s32.totalorder %s88_s20, 0  ;;  %p102_p2 = scmp.eq.s32.totalorder %s2257_s16, 1 }
   0x7   : > { %p107_p3 = scmp.ne.s32.totalorder %s2193_s13, %s2189_s12  ;;  %p108_p4 = scmp.eq.s32.totalorder %s1891_s17, 1 }
   0x8   : > { %s2272_s21 = scalar_select %p89_p1, %s2197_s14, %s91_s19  }
   0x9   : > { %p2274_p5 = por %p102_p2, %p101_p0  ;;  %p2278_p6 = por %p108_p4, %p107_p3 }
   0xa   : > { %p1894_p7 = scmp.ge.s32.totalorder %s2201_s15, 1  ;;  %p140_p8 = scmp.lt.s32.totalorder %s2201_s15, 3 }
   0xc   : > { %p141_p9 = pnand %p1894_p7, %p140_p8 }
   0xd   : > { %p164_p10 = scmp.lt.s32.totalorder (!%p141_p9), %s2257_s16, 1  ;;  %v2203_v0 = vmov (!%p141_p9), 0.0   ;;  %s2204_s29 = smov (!%p141_p9), 127   ;;  %v1784_v4 = vld [vmem:[%s2552_s2] sm:$0xff] (!%p141_p9)  ;;  %v1785_v5 = vld [vmem:[%s2552_s2 + $0x8] sm:$0xff] (!%p141_p9)  ;;  %v2212_v6 = vmov (!%p141_p9), 0  }
   0xe   : > { %144 = sbr.rel (%p141_p9) target bundleno = 459 (0x1cb), region = 32  ;;  %279 = vmatprep.mubr.f32.mxu1 (!%p141_p9), %v2203_v0  ;;  %616 = vmatprep.mubr.f32.mxu0 (!%p141_p9), %v2203_v0  ;;  %s2205_s30 = smov (!%p141_p9), 126   ;;  %vm198_vm0 = vcmask (!%p141_p9), 1039360   ;;  %vm208_vm1 = vcmask (!%p141_p9), 1043456   ;;  %v173_v12 = vld [vmem:[%s2551_s1 + $0x10] sm:$0xff] (!%p141_p9)  ;;  %vm201_vm2 = vcmask (!%p141_p9), 31744  }
   0xf   : > { %s2206_s4 = smov (!%p141_p9), 110   ;;  %s2207_s5 = smov (!%p141_p9), 109   ;;  %2136 = vset.pattern.permute.xlu0 (!%p141_p9), %v2212_v6  ;;  %2137 = vset.pattern.permute.xlu1 (!%p141_p9), %v2212_v6  ;;  %vm537_vm3 = vcmask (!%p141_p9), 1031168   ;;  %v174_v18 = vld [vmem:[%s2551_s1 + $0x18] sm:$0xff] (!%p141_p9)  ;;  %v175_v19 = vld [vmem:[%s2551_s1 + $0x20] sm:$0xff] (!%p141_p9)  ;;  %vm716_vm4 = vcmask (!%p141_p9), 900096  }
  0x10   : > { %s2208_s6 = smov (!%p141_p9), 108   ;;  %s2209_s7 = smov (!%p141_p9), 92   ;;  %v176_v22 = vld [vmem:[%s2551_s1 + $0x28] sm:$0xff] (!%p141_p9)  ;;  %v171_v27 = vld [vmem:[%s2551_s1] sm:$0xff] (!%p141_p9)  ;;  %v177_v28 = vld [vmem:[%s2551_s1 + $0x30] sm:$0xff] (!%p141_p9)  ;;  %vm895_vm5 = vcmask (!%p141_p9), 891904  }
  0x11   : > { %s2210_s8 = smov (!%p141_p9), 91   ;;  %s2211_s9 = smov (!%p141_p9), 90   ;;  %v172_v31 = vld [vmem:[%s2551_s1 + $0x8] sm:$0xff] (!%p141_p9)  ;;  %v178_v32 = vld [vmem:[%s2551_s1 + $0x38] sm:$0xff] (!%p141_p9)  ;;  %vm1074_vm6 = vcmask (!%p141_p9), 883712   ;;  %v179_v37 = vld [vmem:[%s2551_s1 + $0x40] sm:$0xff] (!%p141_p9) }
  0x12   : > { %v180_v41 = vld [vmem:[%s2551_s1 + $0x48] sm:$0xff] (!%p141_p9)  ;;  %vm1253_vm7 = vcmask (!%p141_p9), 752640   ;;  %v181_v45 = vld [vmem:[%s2551_s1 + $0x50] sm:$0xff] (!%p141_p9)  ;;  %vm1432_vm8 = vcmask (!%p141_p9), 744448   ;;  %v182_v50 = vld [vmem:[%s2551_s1 + $0x58] sm:$0xff] (!%p141_p9)  ;;  %vm1611_vm9 = vcmask (!%p141_p9), 736256  }
  0x13   : > { %v183_v53 = vld [vmem:[%s2551_s1 + $0x60] sm:$0xff] (!%p141_p9)  ;;  %v184_v57 = vld [vmem:[%s2551_s1 + $0x68] sm:$0xff] (!%p141_p9)  ;;  %v185_v59 = vld [vmem:[%s2551_s1 + $0x70] sm:$0xff] (!%p141_p9)  ;;  %s161_s20 = sand.u32 (!%p141_p9), 1, %s2193_s13   ;;  %s2084_s27 = smul.u32 (!%p141_p9), 768, %s2257_s16  ;;  %vm1810_vm10 = vcmask (!%p141_p9), 261120  }
  0x14   : > { %v186_v62 = vld [vmem:[%s2551_s1 + $0x78] sm:$0xff] (!%p141_p9)  ;;  %v187_v63 = vld [vmem:[%s2551_s1 + $0x80] sm:$0xff] (!%p141_p9) }
  0x15   : > { %s165_s24 = scalar_select %p164_p10, %s2257_s16, 1 }
  0x16   : > { %s2509_s16 = scalar_lea.sflag [#allocation3], %s161_s20 }
  0x17   : > { %s2083_s25 = smul.u32 12, %s165_s24 }
  0x18   : > { %s2082_s24 = smul.u32 48, %s161_s20 }
  0x19   : > { %s168_s28 = scalar_lea.vmem %s2550_s0, %s2083_s25 }
  0x1a   : > { %v2291_v1 = vld [vmem:[%s168_s28] sm:$0xff]  ;;  %v2299_v3 = vld [vmem:[%s168_s28 + $0x8] sm:$0xf]  ;;  %s163_s25 = scalar_lea.vmem [#allocation2], %s2082_s24 }
  0x1b   : > { %192 = vrot.lane.b32.xlu1 %v2291_v1, %s2204_s29  ;;  %v2296_v2 = vcombine.high %v2291_v1, %v2291_v1  ;;  %s1829_s26 = sshll.u32 %s163_s25, 4  ;;  %s2500_s26 = int_to_ptr.vmem [resolvable:$true] %s1829_s26 }
  0x1d   : > { %194 = vrot.lane.b32.xlu0 %v2296_v2, %s2204_s29 }
  0x1f   : > { %533 = vrot.lane.b32.xlu1 %v2296_v2, %s2205_s30 }
  0x21   : > { %196 = vrot.lane.b32.xlu0 %v2299_v3, %s2204_s29 }
  0x23   : > { %531 = vrot.lane.b32.xlu1 %v2291_v1, %s2205_s30 }
  0x25   : > { %535 = vrot.lane.b32.xlu0 %v2299_v3, %s2205_s30  ;;  %s2505_s30 = scalar_lea.hbm %s2553_s3, %s2084_s27 }
  0x27   : > { %714 = vrot.lane.b32.xlu1 %v2299_v3, %s2206_s4 }
  0x29   : > { %712 = vrot.lane.b32.xlu0 %v2296_v2, %s2206_s4 }
  0x2b   : > { %891 = vrot.lane.b32.xlu1 %v2296_v2, %s2207_s5 }
  0x2d   : > { %710 = vrot.lane.b32.xlu0 %v2291_v1, %s2206_s4  ;;  %s2139_s4 = scalar_lea.vmem %s2500_s26, 768 }
  0x2e   : > { %p2140_p11 = scmp.ne.s32.totalorder %s2500_s26, %s2139_s4 }
  0x2f   : > { %889 = vrot.lane.b32.xlu1 %v2291_v1, %s2207_s5 }
  0x30   : > { %p2141_p12 = pnand %p2140_p11, %p2274_p5 }
  0x31   : > { %893 = vrot.lane.b32.xlu0 %v2299_v3, %s2207_s5  ;;  %s2213_s5 = smov [#allocation2]  }
  0x32   : > { %p2142_p13 = pneg %p2141_p12 }
  0x33   : > { %1072 = vrot.lane.b32.xlu1 %v2299_v3, %s2208_s6 }
  0x35   : > { %1070 = vrot.lane.b32.xlu0 %v2296_v2, %s2208_s6 }
  0x37   : > { %1249 = vrot.lane.b32.xlu1 %v2296_v2, %s2209_s7 }
  0x39   : > { %1068 = vrot.lane.b32.xlu0 %v2291_v1, %s2208_s6  ;;  %s2143_s6 = sshll.u32 %s2213_s5, 4  ;;  %s2144_s6 = int_to_ptr.vmem [resolvable:$false] %s2143_s6 }
  0x3a   : > { %p2146_p0 = scmp.lt.s32.totalorder %s2500_s26, %s2144_s6 }
  0x3b   : > { %1247 = vrot.lane.b32.xlu1 %v2291_v1, %s2209_s7 }
  0x3d   : > { %1251 = vrot.lane.b32.xlu0 %v2299_v3, %s2209_s7  ;;  %s2145_s7 = scalar_lea.vmem %s2144_s6, 1536 }
  0x3e   : > { %p2147_p1 = scmp.lt.s32.totalorder %s2145_s7, %s2139_s4 }
  0x3f   : > { %1430 = vrot.lane.b32.xlu1 %v2299_v3, %s2210_s8 }
  0x40   : > { %p2148_p2 = por %p2147_p1, %p2146_p0 }
  0x41   : > { %1428 = vrot.lane.b32.xlu0 %v2296_v2, %s2210_s8 }
  0x42   : > { %p2149_p3 = pnand %p2148_p2, %p2142_p13 }
  0x43   : > { %1607 = vrot.lane.b32.xlu1 %v2296_v2, %s2211_s9 }
  0x45   : > { %1426 = vrot.lane.b32.xlu0 %v2291_v1, %s2210_s8 }
  0x47   : > { %1605 = vrot.lane.b32.xlu1 %v2291_v1, %s2211_s9 }
  0x49   : > { %1609 = vrot.lane.b32.xlu0 %v2299_v3, %s2211_s9 }
  0x4b   : > { %1793 = vperm.xlu1 %2137, %v1785_v5  }
  0x4d   : > { %1788 = vperm.xlu0 %2136, %v1784_v4  }
  0x8d   : > { %v193_v7 = vpop.permute.xlu1 %192 }
  0x8f   : > { %v195_v8 = vpop.permute.xlu0 %194 }
  0x90   : > { %v199_v13 = vsel %vm198_vm0, %v193_v7, %v195_v8 }
  0x91   : > { %v534_v9 = vpop.permute.xlu1 %533 }
  0x93   : > { %v197_v10 = vpop.permute.xlu0 %196 }
  0x94   : > { %v200_v11 = vsel %vm198_vm0, %v195_v8, %v197_v10 }
  0x95   : > { %1896 = vmatprep.subr.msk.mxu1 %vm208_vm1, %v200_v11  ;;  %v532_v14 = vpop.permute.xlu1 %531 }
  0x96   : > { %1897 = vmatpush1.msk.msra.mxu1 %vm208_vm1, %v199_v13  ;;  %v538_v16 = vsel %vm537_vm3, %v532_v14, %v534_v9 }
  0x97   : > { %1898 = vmatmul.mubr.msk.f32.vlgmr.msra.gmra.mrb[0].mxu1 %vm201_vm2, %v173_v12  ;;  %1989 = vmatprep.subr.msk.mxu1 %vm208_vm1, %v197_v10  ;;  %v536_v15 = vpop.permute.xlu0 %535 }
  0x98   : > { %1990 = vmatpush3.msk.msra.mxu1 %vm208_vm1, %v197_v10  ;;  %v539_v17 = vsel %vm537_vm3, %v534_v9, %v536_v15  ;;  %285 = vmatprep.mubr.f32.mxu1 %v2203_v0 }
  0x99   : > { %1910 = vmatprep.subr.msk.mxu0 %vm208_vm1, %v539_v17  ;;  %v2345_v20 = vpop.permute.xlu1 %714  ;;  %1903 = vmatprep.subr.msk.mxu1 %vm208_vm1, %v2296_v2 }
  0x9a   : > { %1911 = vmatpush1.msk.msra.mxu0 %vm208_vm1, %v538_v16 }
  0x9b   : > { %1899 = vmatmul.mubr.msk.f32.gmra.mrb[2].mxu1 %vm201_vm2, %v174_v18  ;;  %1912 = vmatmul.mubr.msk.f32.vlgmr.msra.gmra.mrb[0].mxu0 %vm201_vm2, %v175_v19  ;;  %v713_v21 = vpop.permute.xlu0 %712 }
  0x9c   : > { %1991 = vmatprep.mubr.msk.f32.mxu1 %vm201_vm2, %v173_v12  ;;  %622 = vmatprep.mubr.f32.mxu0 %v2203_v0  ;;  %v718_v23 = vsel %vm716_vm4, %v713_v21, %v2345_v20 }
  0x9d   : > { %1917 = vmatprep.subr.msk.mxu0 %vm208_vm1, %v718_v23  ;;  %v892_v24 = vpop.permute.xlu1 %891 }
  0x9f   : > { %1992 = vmatmul.mubr.msk.f32.vlgmr.msra.gmra.mrb[4].mxu1 %vm201_vm2, %v174_v18  ;;  %1913 = vmatmul.mubr.msk.f32.gmra.mrb[2].mxu0 %vm201_vm2, %v176_v22  ;;  %v711_v25 = vpop.permute.xlu0 %710 }
  0xa0   : > { %1904 = vmatpush1.msk.msra.mxu1 %vm208_vm1, %v2291_v1  ;;  %v717_v26 = vsel %vm716_vm4, %v711_v25, %v713_v21  ;;  %443 = vmatprep.mubr.f32.mxu1 %v2203_v0  ;;  %v188_v1 = vld [vmem:[%s2551_s1 + $0x88] sm:$0xff] }
  0xa1   : > { %1918 = vmatpush1.msk.msra.mxu0 %vm208_vm1, %v717_v26  ;;  %795 = vmatprep.mubr.f32.mxu0 %v2203_v0  ;;  %v890_v29 = vpop.permute.xlu1 %889 }
  0xa2   : > { %1994 = vmatprep.subr.msk.mxu1 %vm208_vm1, %v2299_v3  ;;  %v896_v34 = vsel %vm895_vm5, %v890_v29, %v892_v24 }
  0xa3   : > { %1905 = vmatmul.mubr.msk.f32.vlgmr.msra.gmra.mrb[0].mxu1 %vm201_vm2, %v171_v27  ;;  %1919 = vmatmul.mubr.msk.f32.vlgmr.msra.gmra.mrb[0].mxu0 %vm201_vm2, %v177_v28  ;;  %v2376_v30 = vpop.permute.xlu0 %893 }
  0xa4   : > { %1995 = vmatpush3.msk.msra.mxu1 %vm208_vm1, %v2299_v3  ;;  %449 = vmatprep.mubr.f32.mxu1 %v2203_v0  ;;  %v897_v33 = vsel %vm895_vm5, %v892_v24, %v2376_v30 }
  0xa5   : > { %1999 = vmatprep.subr.msk.mxu1 %vm208_vm1, %v536_v15  ;;  %801 = vmatprep.mubr.f32.mxu0 %v2203_v0  ;;  %v2390_v35 = vpop.permute.xlu1 %1072 }
  0xa6   : > { %1924 = vmatprep.subr.msk.mxu0 %vm208_vm1, %v897_v33 }
  0xa7   : > { %1906 = vmatmul.mubr.msk.f32.gmra.mrb[2].mxu1 %vm201_vm2, %v172_v31  ;;  %1920 = vmatmul.mubr.msk.f32.gmra.mrb[2].mxu0 %vm201_vm2, %v178_v32  ;;  %v1071_v36 = vpop.permute.xlu0 %1070 }
  0xa8   : > { %1996 = vmatprep.mubr.msk.f32.mxu1 %vm201_vm2, %v171_v27  ;;  %1925 = vmatpush1.msk.msra.mxu0 %vm208_vm1, %v896_v34  ;;  %v1076_v38 = vsel %vm1074_vm6, %v1071_v36, %v2390_v35 }
  0xa9   : > { %974 = vmatprep.mubr.f32.mxu0 %v2203_v0  ;;  %1931 = vmatprep.subr.msk.mxu0 %vm208_vm1, %v1076_v38  ;;  %v1250_v39 = vpop.permute.xlu1 %1249 }
  0xab   : > { %1997 = vmatmul.mubr.msk.f32.vlgmr.msra.gmra.mrb[4].mxu1 %vm201_vm2, %v172_v31  ;;  %1926 = vmatmul.mubr.msk.f32.vlgmr.msra.gmra.mrb[0].mxu0 %vm201_vm2, %v179_v37  ;;  %v1069_v40 = vpop.permute.xlu0 %1068 }
  0xac   : > { %2000 = vmatpush3.msk.msra.mxu1 %vm208_vm1, %v536_v15  ;;  %980 = vmatprep.mubr.f32.mxu0 %v2203_v0  ;;  %v1075_v42 = vsel %vm1074_vm6, %v1069_v40, %v1071_v36 }
  0xad   : > { %2004 = vmatprep.subr.msk.mxu1 %vm208_vm1, %v2345_v20  ;;  %2001 = vmatprep.mubr.msk.f32.mxu1 %vm201_vm2, %v175_v19  ;;  %v1248_v43 = vpop.permute.xlu1 %1247 }
  0xae   : > { %1932 = vmatpush1.msk.msra.mxu0 %vm208_vm1, %v1075_v42  ;;  %v1254_v48 = vsel %vm1253_vm7, %v1248_v43, %v1250_v39 }
  0xaf   : > { %1927 = vmatmul.mubr.msk.f32.gmra.mrb[2].mxu0 %vm201_vm2, %v180_v41  ;;  %v1252_v44 = vpop.permute.xlu0 %1251 }
  0xb0   : > { %1153 = vmatprep.mubr.f32.mxu0 %v2203_v0  ;;  %v1255_v46 = vsel %vm1253_vm7, %v1250_v39, %v1252_v44 }
  0xb1   : > { %1938 = vmatprep.subr.msk.mxu0 %vm208_vm1, %v1255_v46  ;;  %v1431_v47 = vpop.permute.xlu1 %1430 }
  0xb3   : > { %2002 = vmatmul.mubr.msk.f32.vlgmr.msra.gmra.mrb[4].mxu1 %vm201_vm2, %v176_v22  ;;  %1933 = vmatmul.mubr.msk.f32.vlgmr.msra.gmra.mrb[0].mxu0 %vm201_vm2, %v181_v45  ;;  %v1429_v49 = vpop.permute.xlu0 %1428 }
  0xb4   : > { %2005 = vmatpush3.msk.msra.mxu1 %vm208_vm1, %v2345_v20  ;;  %1159 = vmatprep.mubr.f32.mxu0 %v2203_v0  ;;  %v1434_v51 = vsel %vm1432_vm8, %v1429_v49, %v1431_v47 }
  0xb5   : > { %2009 = vmatprep.subr.msk.mxu1 %vm208_vm1, %v2376_v30  ;;  %2006 = vmatprep.mubr.msk.f32.mxu1 %vm201_vm2, %v177_v28  ;;  %v1608_v54 = vpop.permute.xlu1 %1607 }
  0xb6   : > { %1939 = vmatpush1.msk.msra.mxu0 %vm208_vm1, %v1254_v48 }
  0xb7   : > { %1934 = vmatmul.mubr.msk.f32.gmra.mrb[2].mxu0 %vm201_vm2, %v182_v50  ;;  %v1427_v52 = vpop.permute.xlu0 %1426  ;;  %1945 = vmatprep.subr.msk.mxu0 %vm208_vm1, %v1434_v51 }
  0xb8   : > { %1332 = vmatprep.mubr.f32.mxu0 %v2203_v0  ;;  %v1433_v55 = vsel %vm1432_vm8, %v1427_v52, %v1429_v49 }
  0xb9   : > { %v1606_v60 = vpop.permute.xlu1 %1605 }
  0xba   : > { %v1612_v61 = vsel %vm1611_vm9, %v1606_v60, %v1608_v54 }
  0xbb   : > { %2007 = vmatmul.mubr.msk.f32.vlgmr.msra.gmra.mrb[4].mxu1 %vm201_vm2, %v178_v32  ;;  %1940 = vmatmul.mubr.msk.f32.vlgmr.msra.gmra.mrb[0].mxu0 %vm201_vm2, %v183_v53  ;;  %v1610_v56 = vpop.permute.xlu0 %1609 }
  0xbc   : > { %2010 = vmatpush3.msk.msra.mxu1 %vm208_vm1, %v2376_v30  ;;  %1338 = vmatprep.mubr.f32.mxu0 %v2203_v0  ;;  %v1613_v58 = vsel %vm1611_vm9, %v1608_v54, %v1610_v56 }
  0xbd   : > { %2014 = vmatprep.subr.msk.mxu1 %vm208_vm1, %v2390_v35  ;;  %2011 = vmatprep.mubr.msk.f32.mxu1 %vm201_vm2, %v179_v37 }
  0xbe   : > { %1946 = vmatpush1.msk.msra.mxu0 %vm208_vm1, %v1433_v55 }
  0xbf   : > { %1941 = vmatmul.mubr.msk.f32.gmra.mrb[2].mxu0 %vm201_vm2, %v184_v57  ;;  %1952 = vmatprep.subr.msk.mxu0 %vm208_vm1, %v1613_v58 }
  0xc0   : > { %1511 = vmatprep.mubr.f32.mxu0 %v2203_v0 }
  0xc3   : > { %2012 = vmatmul.mubr.msk.f32.vlgmr.msra.gmra.mrb[4].mxu1 %vm201_vm2, %v180_v41  ;;  %1947 = vmatmul.mubr.msk.f32.vlgmr.msra.gmra.mrb[0].mxu0 %vm201_vm2, %v185_v59 }
  0xc4   : > { %2015 = vmatpush3.msk.msra.mxu1 %vm208_vm1, %v2390_v35  ;;  %1517 = vmatprep.mubr.f32.mxu0 %v2203_v0 }
  0xc5   : > { %2019 = vmatprep.subr.msk.mxu1 %vm208_vm1, %v1252_v44  ;;  %2016 = vmatprep.mubr.msk.f32.mxu1 %vm201_vm2, %v181_v45 }
  0xc6   : > { %1953 = vmatpush1.msk.msra.mxu0 %vm208_vm1, %v1612_v61 }
  0xc7   : > { %1948 = vmatmul.mubr.msk.f32.gmra.mrb[2].mxu0 %vm201_vm2, %v186_v62 }
  0xc8   : > { %1690 = vmatprep.mubr.f32.mxu0 %v2203_v0 }
  0xca   : > { %v1794_v13 = vpop.permute.xlu1 %1793 }
  0xcb   : > { %2017 = vmatmul.mubr.msk.f32.vlgmr.msra.gmra.mrb[4].mxu1 %vm201_vm2, %v182_v50  ;;  %1954 = vmatmul.mubr.msk.f32.vlgmr.msra.gmra.mrb[0].mxu0 %vm201_vm2, %v187_v63 }
  0xcc   : > { %2020 = vmatpush3.msk.msra.mxu1 %vm208_vm1, %v1252_v44  ;;  %1696 = vmatprep.mubr.f32.mxu0 %v2203_v0  ;;  %v1789_v6 = vpop.permute.xlu0 %1788 }
  0xcd   : > { %2024 = vmatprep.subr.msk.mxu1 %vm208_vm1, %v1431_v47  ;;  %2021 = vmatprep.mubr.msk.f32.mxu1 %vm201_vm2, %v183_v53 }
  0xcf   : > { %1955 = vmatmul.mubr.msk.f32.gmra.mrb[2].mxu0 %vm201_vm2, %v188_v1 }
  0xd3   : > { %2022 = vmatmul.mubr.msk.f32.vlgmr.msra.gmra.mrb[4].mxu1 %vm201_vm2, %v184_v57 }
  0xd4   : > { %2025 = vmatpush3.msk.msra.mxu1 %vm208_vm1, %v1431_v47  ;;  %2026 = vmatprep.mubr.msk.f32.mxu1 %vm201_vm2, %v185_v59 }
  0xd5   : > { %2029 = vmatprep.subr.msk.mxu1 %vm208_vm1, %v1610_v56 }
  0xdb   : > { %2027 = vmatmul.mubr.msk.f32.vlgmr.msra.gmra.mrb[4].mxu1 %vm201_vm2, %v186_v62 }
  0xdc   : > { %2030 = vmatpush3.msk.msra.mxu1 %vm208_vm1, %v1610_v56  ;;  %2031 = vmatprep.mubr.msk.f32.mxu1 %vm201_vm2, %v187_v63 }
  0xe3   : > { %2032 = vmatmul.mubr.msk.f32.vlgmr.msra.gmra.mrb[4].mxu1 %vm201_vm2, %v188_v1 }
 0x176   : > { %v445_v0 = vpop.f32.mrb[0].mxu1 }
 0x177   : > { %v447_v2 = vpop.f32.mrb[1].mxu1 }
 0x17a   : > { %v451_v3 = vpop.f32.mrb[2].mxu1 }
 0x17b   : > { %v453_v4 = vpop.f32.mrb[3].mxu1 }
 0x19e   : > { %v1692_v5 = vpop.f32.mrb[0].mxu0 }
 0x19f   : > { %v2034_v7 = vadd.f32 %v1692_v5, %v445_v0  ;;  %v1694_v8 = vpop.f32.mrb[1].mxu0 }
 0x1a0   : > { %v2035_v9 = vadd.f32 %v1694_v8, %v447_v2 }
 0x1a1   : > { %v1796_v10 = vadd.f32 %v2034_v7, %v1789_v6 }
 0x1a2   : > { %v1797_v11 = vadd.f32 %v2035_v9, %v1789_v6  ;;  %v1698_v12 = vpop.f32.mrb[2].mxu0 }
 0x1a3   : > { %v1802_v14 = vmax.f32 %v1796_v10, 0.0  ;;  %v2036_v15 = vadd.f32 %v1698_v12, %v451_v3  ;;  %v1700_v16 = vpop.f32.mrb[3].mxu0 }
 0x1a4   : > { %v1803_v17 = vmax.f32 %v1797_v11, 0.0  ;;  %v2037_v18 = vadd.f32 %v1700_v16, %v453_v4 }
 0x1a5   : > { %1808 = vst [vmem:[%s163_s25] sm:$0xff] %v1802_v14  ;;  %v1799_v19 = vadd.f32 %v2036_v15, %v1794_v13 }
 0x1a6   : > { %1809 = vst [vmem:[%s163_s25 + $0x8] sm:$0xff] %v1803_v17  ;;  %v1800_v20 = vadd.f32 %v2037_v18, %v1794_v13 }
 0x1a7   : > { %v1805_v21 = vmax.f32 %v1799_v19, 0.0 }
 0x1a8   : > { %v1806_v22 = vmax.f32 %v1800_v20, 0.0 }
 0x1a9   : > { %1812 = vst [vmem:[%s163_s25 + $0x18] sm:$0xff] %v1805_v21 }
 0x1aa   : > { %1813 = vst [vmem:[%s163_s25 + $0x20] sm:$0xff] %v1806_v22 }
 0x1b6   : > { %v2033_v23 = vpop.f32.mrb[4].mxu1 }
 0x1b7   : > { %v1801_v24 = vadd.f32 %v2033_v23, %v1794_v13  ;;  %v1769_v25 = vpop.f32.mrb[5].mxu1 }
 0x1b8   : > { %v1798_v26 = vadd.f32 %v1789_v6, %v1769_v25 }
 0x1b9   : > { %v1807_v27 = vmax.f32 %v1801_v24, 0.0 }
 0x1ba   : > { %v1804_v28 = vmax.f32 %v1798_v26, 0.0 }
 0x1bb   : > { %1814 = vst.msk [vmem:[%s163_s25 + $0x28] sm:$0xff] %vm1810_vm10, %v1807_v27 }
 0x1bc   : > { %1811 = vst.msk [vmem:[%s163_s25 + $0x10] sm:$0xff] %vm1810_vm10, %v1804_v28 }
 0x1bd   : > { %2152 = shalt.err (!%p2149_p3)
}
 0x1be   : > { %s2153_s8 = scalar_lea.hbm %s2505_s30, 768  ;;  %s2157_s11 = scalar_lea.hbm %s2553_s3, 1536 }
 0x1bf   : > { %p2154_p4 = scmp.ne.s32.totalorder %s2505_s30, %s2153_s8  ;;  %p2158_p9 = scmp.lt.u32.totalorder %s2505_s30, %s2553_s3 }
 0x1c0   : > { %p2159_p10 = scmp.lt.u32.totalorder %s2157_s11, %s2153_s8  ;;  %p2161_p12 = scmp.lt.u32.totalorder %s2153_s8, %s2505_s30 }
 0x1c1   : > { %p2155_p7 = pnand %p2154_p4, %p2274_p5 }
 0x1c2   : > { %p2160_p11 = por %p2159_p10, %p2158_p9 }
 0x1c3   : > { %p2156_p8 = pneg %p2155_p7 }
 0x1c4   : > { %p2162_p13 = por %p2161_p12, %p2160_p11 }
 0x1c6   : > { %p2163_p0 = pnand %p2162_p13, %p2156_p8 }
 0x1c8   : > { %2166 = shalt.err (!%p2163_p0)
}
 0x1c9   : > { %s2214_s20 = smov 384   ;;  %s2215_s24 = smov 24  }
 0x1ca   : > { %2085 = dma.vmem_to_hbm [thread:$0]  (%p2274_p5), %s2500_s26, 768, %s2505_s30, %s2509_s16, %s2214_s20, %s2214_s20, %s2215_s24  }
 0x1cb PF: > { %p2091_p1 = scmp.ge.s32.totalorder %s2201_s15, 2  ;;  %s1844_s25 = sand.u32 1, %s2189_s12  }
 0x1cc   : > { %s1845_s27 = scalar_lea.sflag [#allocation3], %s1844_s25 }
 0x1cd   : > { %p2088_p2 = pnand %p2091_p1, %p2278_p6 }
 0x1cf   : > { %2184 = dma.done.wait (!%p2088_p2), %s1845_s27, 768  }
 0x1d0   : > { %2186 = vsyncadd (!%p2088_p2), %s1845_s27, 4294966528  ;;  %p13_p3 = scmp.ge.s32.totalorder %s2261_s18, 4   ;;  %s2556_s12 = smov %s2193_s13 }
 0x1d1   : > { %s2557_s13 = smov %s2197_s14  ;;  %s2558_s14 = smov %s2272_s21 }
 0x1d2   : > { %s2559_s15 = smov %s2261_s18  ;;  %15 = sbr.rel (!%p13_p3) target bundleno = 3 (0x3), region = 67 }
 0x1d9   :  { %1850 = vsyncpa [#allocation3], 1 }
 0x1da   :  { %1852 = vsyncpa [#allocation3 + $0x1], 1 }

</bundles_post_ra>
